<compile_context>
chip_gen: v7x
topology: tpu7x:2x2x1
jax: 0.10.0
libtpu: 0.0.40
codegen_flags: <defaults>
</compile_context>

<pallas_src>
import functools

import jax
import jax.numpy as jnp
from jax.experimental import pallas as pl
from jax.experimental.pallas import tpu as pltpu


def _round_up(x: int, m: int) -> int:
    return ((x + m - 1) // m) * m


def _pick_batch_tile(batch: int, tb: int) -> int:
    """Multiple-of-8 batch tile; even tile count (v7x megacore) when B > TB."""
    tb = _round_up(min(max(tb, 8), _round_up(batch, 8)), 8)
    if batch > tb:
        n = pl.cdiv(batch, tb)
        if n % 2:  # keep the tile count even so both v7x TensorCores get work
            n += 1
        tb = _round_up(pl.cdiv(batch, n), 8)
    return tb


def _decoder_kernel(z_ref, w1_ref, b1_ref, w2_ref, b2_ref, out_ref):
    # z:  [TB, L] f32   w1: [L, H] bf16   b1: [1, H] f32
    # w2: [H, O] bf16   b2: [1, O] f32    out: [TB, O] out_dtype
    # Cast the activation tile to bf16 on the VPU (hidden under MXU work) so
    # both matmuls run at native bf16 MXU rate with f32 accumulation.
    z = z_ref[...].astype(w1_ref.dtype)

    # Linear 1 (MXU) + bias + ReLU epilogue in f32 (VPU).
    h = jnp.dot(z, w1_ref[...], preferred_element_type=jnp.float32)
    h = jnp.maximum(h + b1_ref[...], 0.0)

    # Linear 2: bf16 operands, f32 accumulation, f32 bias add.
    y = jnp.dot(h.astype(w2_ref.dtype), w2_ref[...],
                preferred_element_type=jnp.float32)
    y = y + b2_ref[...]

    # Downcast only at the final store (bf16 output halves HBM writeback).
    out_ref[...] = y.astype(out_ref.dtype)


def prepare_decoder_params(w1, b1, w2, b2):
    """One-time parameter prep (hoists dtype casts out of the per-call path)."""
    return (
        w1.astype(jnp.bfloat16),                       # [L, H]
        b1.astype(jnp.float32).reshape(1, -1),         # [1, H]
        w2.astype(jnp.bfloat16),                       # [H, O]
        b2.astype(jnp.float32).reshape(1, -1),         # [1, O]
    )


def decoder_forward(z, params, *, tb: int = 512, out_dtype=jnp.bfloat16):
    """Pallas implementation of Decoder.forward(x) == network(x).

    `params` comes from prepare_decoder_params.  Pass out_dtype=jnp.float32 to
    exactly match the PyTorch module's output dtype.
    """
    w1, b1, w2, b2 = params
    B, L = z.shape
    H = w1.shape[1]
    O = w2.shape[1]

    tb = _pick_batch_tile(B, tb)
    grid = (pl.cdiv(B, tb),)  # ragged last tile: OOB reads padded, stores masked

    out_itemsize = jnp.dtype(out_dtype).itemsize
    z_itemsize = jnp.dtype(z.dtype).itemsize

    flops = 2 * B * (L * H + H * O)
    bytes_accessed = (
        B * L * z_itemsize                                  # activation reads
        + w1.size * 2 + w2.size * 2                         # bf16 weight reads
        + (b1.size + b2.size) * 4                           # f32 bias reads
        + B * O * out_itemsize                              # output writeback
    )

    # Explicit VMEM budget: double-buffered activation/output tiles, resident
    # (double-buffered) weights/biases, plus the f32 intermediate.  Clamped to
    # stay inside v7x's 64 MiB physical VMEM (32 MiB scoped default).
    vmem_bytes = (
        2 * tb * L * z_itemsize
        + 2 * tb * O * out_itemsize
        + 2 * (w1.size * 2 + w2.size * 2 + (b1.size + b2.size) * 4)
        + tb * H * 4
    )
    vmem_limit = int(min(max(2 * vmem_bytes, 16 * 1024 * 1024),
                         64 * 1024 * 1024))

    return pl.pallas_call(
        _decoder_kernel,
        out_shape=jax.ShapeDtypeStruct((B, O), out_dtype),
        grid_spec=pltpu.PrefetchScalarGridSpec(
            num_scalar_prefetch=0,
            grid=grid,
            in_specs=[
                # Activation tile marches down the batch (f32, cast in-kernel).
                pl.BlockSpec((tb, L), lambda i: (i, 0)),
                # Weights / biases: full-size, VMEM-resident (constant index).
                pl.BlockSpec((L, H), lambda i: (0, 0)),
                pl.BlockSpec((1, H), lambda i: (0, 0)),
                pl.BlockSpec((H, O), lambda i: (0, 0)),
                pl.BlockSpec((1, O), lambda i: (0, 0)),
            ],
            out_specs=pl.BlockSpec((tb, O), lambda i: (i, 0)),
        ),
        compiler_params=pltpu.CompilerParams(
            # Independent batch tiles -> shard across TensorCores (v7x megacore).
            dimension_semantics=("parallel",),
            vmem_limit_bytes=vmem_limit,
        ),
        cost_estimate=pl.CostEstimate(
            flops=flops, bytes_accessed=bytes_accessed, transcendentals=0),
    )(z, w1, b1, w2, b2)


def _reference_forward(z, w1, b1, w2, b2):
    h = jnp.maximum(z @ w1 + b1, 0.0)
    return h @ w2 + b2


if __name__ == "__main__":
    # Lane-dense feature dims (multiples of 128); B chosen so the kernel
    # exercises multiple batch tiles AND a masked ragged last tile.
    B, LATENT, HIDDEN, OUT = 600, 128, 256, 128

    key = jax.random.PRNGKey(0)
    k_z, k_w1, k_b1, k_w2, k_b2 = jax.random.split(key, 5)

    # Deterministic synthetic parameters (PyTorch-like uniform init scale).
    z = jax.random.normal(k_z, (B, LATENT), dtype=jnp.float32)
    w1 = jax.random.uniform(k_w1, (LATENT, HIDDEN), minval=-1.0, maxval=1.0,
                            dtype=jnp.float32) / jnp.sqrt(LATENT)
    b1 = jax.random.uniform(k_b1, (1, HIDDEN), minval=-1.0, maxval=1.0,
                            dtype=jnp.float32) / jnp.sqrt(LATENT)
    w2 = jax.random.uniform(k_w2, (HIDDEN, OUT), minval=-1.0, maxval=1.0,
                            dtype=jnp.float32) / jnp.sqrt(HIDDEN)
    b2 = jax.random.uniform(k_b2, (1, OUT), minval=-1.0, maxval=1.0,
                            dtype=jnp.float32) / jnp.sqrt(HIDDEN)

    # Cast weights once at init (off the hot path), jit the forward.
    params = prepare_decoder_params(w1, b1, w2, b2)
    fwd = jax.jit(functools.partial(decoder_forward, tb=512,
                                    out_dtype=jnp.bfloat16))

    out = jax.block_until_ready(fwd(z, params))

    # Reference with the same bf16-rounded matmul operands (f32 accumulation),
    # so the remaining differences are MXU accumulation order + bf16 output.
    z_r = z.astype(jnp.bfloat16).astype(jnp.float32)
    w1_r = w1.astype(jnp.bfloat16).astype(jnp.float32)
    w2_r = w2.astype(jnp.bfloat16).astype(jnp.float32)
    ref = _reference_forward(z_r, w1_r, b1, w2_r, b2)

    assert out.shape == (B, OUT)
    assert out.dtype == jnp.bfloat16
    assert jnp.allclose(out.astype(jnp.float32), ref, atol=3e-2, rtol=3e-2), \
        "mismatch vs reference"

    print("KERNEL_OK")
</pallas_src>

<mosaic_0001>
module attributes {stable_mosaic.version = 11 : i64} {
  func.func @_decoder_kernel(%arg0: i32, %arg1: memref<304x128xf32, #tpu.memory_space<vmem>>, %arg2: memref<128x256xbf16, #tpu.memory_space<vmem>>, %arg3: memref<1x256xf32, #tpu.memory_space<vmem>>, %arg4: memref<256x128xbf16, #tpu.memory_space<vmem>>, %arg5: memref<1x128xf32, #tpu.memory_space<vmem>>, %arg6: memref<304x128xbf16, #tpu.memory_space<vmem>>) attributes {dimension_semantics = [#tpu.dimension_semantics<parallel>], iteration_bounds = array<i64: 2>, scalar_prefetch = 0 : i64, scratch_operands = 0 : i64, tpu.core_type = #tpu.core_type<tc>, window_params = [{transform_indices = @transform_0, window_bounds = array<i64: 304, 128>}, {pipeline_mode = #tpu.pipeline_mode<synchronous>, transform_indices = @transform_1, window_bounds = array<i64: 128, 256>}, {pipeline_mode = #tpu.pipeline_mode<synchronous>, transform_indices = @transform_2, window_bounds = array<i64: 1, 256>}, {pipeline_mode = #tpu.pipeline_mode<synchronous>, transform_indices = @transform_3, window_bounds = array<i64: 256, 128>}, {pipeline_mode = #tpu.pipeline_mode<synchronous>, transform_indices = @transform_4, window_bounds = array<i64: 1, 128>}, {transform_indices = @transform_5, window_bounds = array<i64: 304, 128>}]} {
    %c0 = arith.constant 0 : index
    %c0_0 = arith.constant 0 : index
    %0 = vector.load %arg1[%c0, %c0_0] : memref<304x128xf32, #tpu.memory_space<vmem>>, vector<304x128xf32>
    %1 = arith.truncf %0 : vector<304x128xf32> to vector<304x128xbf16>
    %c0_1 = arith.constant 0 : index
    %c0_2 = arith.constant 0 : index
    %2 = vector.load %arg2[%c0_1, %c0_2] : memref<128x256xbf16, #tpu.memory_space<vmem>>, vector<128x256xbf16>
    %cst = arith.constant dense<0.000000e+00> : vector<304x256xf32>
    %3 = tpu.matmul %1, %2, %cst {dimension_numbers = #tpu.dot_dimension_numbers<[1], [0], [0], [1], [0, 0, 1, 1], [], []>} : vector<304x128xbf16>, vector<128x256xbf16>, vector<304x256xf32> -> vector<304x256xf32>
    %c0_3 = arith.constant 0 : index
    %c0_4 = arith.constant 0 : index
    %4 = vector.load %arg3[%c0_3, %c0_4] : memref<1x256xf32, #tpu.memory_space<vmem>>, vector<1x256xf32>
    %5 = vector.broadcast %4 : vector<1x256xf32> to vector<304x256xf32>
    %6 = arith.addf %3, %5 : vector<304x256xf32>
    %cst_5 = arith.constant 0.000000e+00 : f32
    %7 = vector.broadcast %cst_5 : f32 to vector<304x256xf32>
    %8 = arith.maximumf %6, %7 : vector<304x256xf32>
    %9 = arith.truncf %8 : vector<304x256xf32> to vector<304x256xbf16>
    %c0_6 = arith.constant 0 : index
    %c0_7 = arith.constant 0 : index
    %10 = vector.load %arg4[%c0_6, %c0_7] : memref<256x128xbf16, #tpu.memory_space<vmem>>, vector<256x128xbf16>
    %cst_8 = arith.constant dense<0.000000e+00> : vector<304x128xf32>
    %11 = tpu.matmul %9, %10, %cst_8 {dimension_numbers = #tpu.dot_dimension_numbers<[1], [0], [0], [1], [0, 0, 1, 1], [], []>} : vector<304x256xbf16>, vector<256x128xbf16>, vector<304x128xf32> -> vector<304x128xf32>
    %c0_9 = arith.constant 0 : index
    %c0_10 = arith.constant 0 : index
    %12 = vector.load %arg5[%c0_9, %c0_10] : memref<1x128xf32, #tpu.memory_space<vmem>>, vector<1x128xf32>
    %13 = vector.broadcast %12 : vector<1x128xf32> to vector<304x128xf32>
    %14 = arith.addf %11, %13 : vector<304x128xf32>
    %15 = arith.truncf %14 : vector<304x128xf32> to vector<304x128xbf16>
    %c0_11 = arith.constant 0 : index
    %c0_12 = arith.constant 0 : index
    %16 = vector.load %arg6[%c0_11, %c0_12] : memref<304x128xbf16, #tpu.memory_space<vmem>>, vector<304x128xbf16>
    tpu.vector_store %arg6[%c0_11, %c0_12], %15 {strides = array<i32>} : memref<304x128xbf16, #tpu.memory_space<vmem>>, vector<304x128xbf16>,
    return
  }
  func.func @transform_0(%arg0: i32) -> (i32, i32) {
    %c0_i32 = arith.constant 0 : i32
    %c0_i32_0 = arith.constant 0 : i32
    return %arg0, %c0_i32 : i32, i32
  }
  func.func @transform_1(%arg0: i32) -> (i32, i32) {
    %c0_i32 = arith.constant 0 : i32
    %c0_i32_0 = arith.constant 0 : i32
    %c0_i32_1 = arith.constant 0 : i32
    return %c0_i32, %c0_i32_0 : i32, i32
  }
  func.func @transform_2(%arg0: i32) -> (i32, i32) {
    %c0_i32 = arith.constant 0 : i32
    %c0_i32_0 = arith.constant 0 : i32
    %c0_i32_1 = arith.constant 0 : i32
    return %c0_i32, %c0_i32_0 : i32, i32
  }
  func.func @transform_3(%arg0: i32) -> (i32, i32) {
    %c0_i32 = arith.constant 0 : i32
    %c0_i32_0 = arith.constant 0 : i32
    %c0_i32_1 = arith.constant 0 : i32
    return %c0_i32, %c0_i32_0 : i32, i32
  }
  func.func @transform_4(%arg0: i32) -> (i32, i32) {
    %c0_i32 = arith.constant 0 : i32
    %c0_i32_0 = arith.constant 0 : i32
    %c0_i32_1 = arith.constant 0 : i32
    return %c0_i32, %c0_i32_0 : i32, i32
  }
  func.func @transform_5(%arg0: i32) -> (i32, i32) {
    %c0_i32 = arith.constant 0 : i32
    %c0_i32_0 = arith.constant 0 : i32
    return %arg0, %c0_i32 : i32, i32
  }
}

</mosaic_0001>

<bundles_post_ra>
// kernel: decoder_forward.1
= control target key start
LH: loop header
LB: loop body
LE: loop exit
PB: predicated region body
PF: predicated region fallthrough
CT: control target
= control target key end

     0   :  { %10 = vsyncpa [#allocation3], 0  ;;  %s2485_s0 = inlined_call_operand.hbm [shape: f32[600,128], index: 0, kind: input, shape index: {}]   ;;  %s2486_s1 = inlined_call_operand.hbm [shape: bf16[128,256], index: 1, kind: input, shape index: {}]   ;;  %s2487_s2 = inlined_call_operand.vmem [shape: f32[1,256], index: 2, kind: input, shape index: {}]   ;;  %s2488_s3 = inlined_call_operand.hbm [shape: bf16[256,128], index: 3, kind: input, shape index: {}]   ;;  %s2489_s4 = inlined_call_operand.vmem [shape: f32[1,128], index: 4, kind: input, shape index: {}]   ;;  %s2490_s5 = inlined_call_operand.hbm [shape: bf16[600,128], index: 5, kind: output, shape index: {}]  }
   0x1   :  { %12 = vsyncpa [#allocation3 + $0x1], 0 }
   0x2   :  { %13 = vsyncpa [#allocation6], 0 }
   0x3   :  { %14 = vsyncpa [#allocation4], 0 }
   0x4   :  { %16 = vsyncpa [#allocation4 + $0x1], 0  ;;  %s2000_s18 = smov 0   ;;  %s2002_s19 = smov 0  }
   0x5   :  { %s2004_s20 = smov 0   ;;  %s2006_s21 = smov 0  }
   0x6 LB: > { %s2021_s22 = sadd.s32 4294967295, %s1955_s21   ;;  %s1413_s23 = sadd.s32 4294967294, %s1955_s21   ;;  %s1955_s21 = sphi %s2006_s21, %s2512_s21   ;;  %s1951_s20 = sphi %s2004_s20, %s2511_s20   ;;  %s1947_s19 = sphi %s2002_s19, %s2510_s19   ;;  %s1943_s18 = sphi %s2000_s18, %s2509_s18  }
   0x7   : > { %s2025_s24 = sadd.s32 1, %s1955_s21   ;;  %s29_s25 = sadd.s32 1, %s1951_s20 }
   0x8   : > { %s26_s26 = ssub.s32 %s1955_s21, %s2025_s24  ;;  %p36_p0 = scmp.ne.s32.totalorder %s1951_s20, %s1947_s19 }
   0x9   : > { %p27_p1 = scmp.eq.s32.totalorder %s26_s26, 0  ;;  %p37_p2 = scmp.eq.s32.totalorder %s1955_s21, 0 }
   0xa   : > { %p42_p3 = scmp.ne.s32.totalorder %s1947_s19, %s1943_s18  ;;  %p2491_p4 = scmp.eq.s32.totalorder %s2021_s22, 0 }
   0xb   : > { %s2037_s27 = scalar_select %p27_p1, %s1951_s20, %s29_s25  }
   0xc   : > { %p2039_p5 = por %p37_p2, %p36_p0  ;;  %p2045_p6 = por %p2491_p4, %p42_p3 }
   0xd   : > { %2494 = sst [smem:[#allocation12_spill]] %s2037_s27  ;;  %p150_p7 = scmp.eq.s32.totalorder %s2021_s22, 1 }
   0xe   : > { %s2495_s28 = scalar_select %p2039_p5, 1, 0 }
   0xf   : > { %s2496_s29 = scalar_select %p2045_p6, 1, 0 }
  0x10   : > { %p156_p8 = scmp.eq.s32.totalorder %s1413_s23, 1  ;;  %p1414_p9 = scmp.ge.s32.totalorder %s1955_s21, 1 }
  0x11   : > { %p163_p10 = scmp.lt.s32.totalorder %s1955_s21, 3  ;;  %p2052_p11 = por %p150_p7, %p36_p0 }
  0x12   : > { %p2056_p12 = por %p156_p8, %p42_p3  ;;  %s1957_s8 = smov [#allocation5]  }
  0x13   : > { %s2497_s30 = scalar_select %p2052_p11, 1, 0 }
  0x14   : > { %s2498_s6 = scalar_select %p2056_p12, 1, 0 }
  0x15   : > { %p2060_p13 = pnand %p1414_p9, %p163_p10  ;;  %s175_s9 = sshll.u32 %s1957_s8, 4  ;;  %s176_s9 = int_to_ptr.vmem [resolvable:$true] %s175_s9 }
  0x16   : > { %s1958_s11 = smov [#allocation7]   ;;  %s1801_s15 = scalar_lea.hbm %s2486_s1, 2048 }
  0x17   : > { %s2499_s7 = scalar_select %p2060_p13, 1, 0 }
  0x18   : > { %p1702_p1 = pneg %p2060_p13  ;;  %s191_s12 = sshll.u32 %s1958_s11, 4  ;;  %s2072_s12 = int_to_ptr.vmem [resolvable:$true] %s191_s12 }
  0x19   : > { %p1802_p0 = scmp.ne.s32.totalorder %s2486_s1, %s1801_s15  ;;  %p1808_p9 = scmp.lt.u32.totalorder %s1801_s15, %s2486_s1 }
  0x1a   : > { %p2068_p2 = pnand %p1702_p1, %p2491_p4 }
  0x1c   : > { %p1803_p3 = pneg %p2068_p2 }
  0x1e   : > { %p1804_p7 = pnand %p1803_p3, %p1802_p0 }
  0x20   : > { %p1805_p8 = pneg %p1804_p7 }
  0x22   : > { %p1810_p10 = pnand %p1808_p9, %p1805_p8 }
  0x24   : > { %1813 = shalt.err (!%p1810_p10)
}
  0x25   : > { %s1814_s26 = scalar_lea.vmem %s176_s9, 2048  ;;  %p1822_p11 = scmp.lt.s32.totalorder %s176_s9, %s176_s9 }
  0x26   : > { %p1815_p1 = scmp.ne.s32.totalorder %s176_s9, %s1814_s26  ;;  %p1823_p6 = scmp.lt.s32.totalorder %s1814_s26, %s1814_s26 }
  0x28   : > { %p1817_p4 = pnand %p1815_p1, %p1803_p3  ;;  %p1824_p13 = por %p1823_p6, %p1822_p11 }
  0x2a   : > { %p1818_p12 = pneg %p1817_p4 }
  0x2c   : > { %p1825_p5 = pnand %p1824_p13, %p1818_p12 }
  0x2e   : > { %1828 = shalt.err (!%p1825_p5)
}
  0x2f   : > { %s1959_s8 = smov 128   ;;  %s1960_s11 = smov 8  }
  0x30   : > { %1705 = dma.hbm_to_vmem [thread:$0]  (!%p2068_p2), %s2486_s1, 2048, %s176_s9, [#allocation6], %s1959_s8, %s1959_s8, %s1960_s11  }
  0x31   : > { %s1829_s17 = scalar_lea.hbm %s2488_s3, 2048 }
  0x32   : > { %p1830_p4 = scmp.ne.s32.totalorder %s2488_s3, %s1829_s17  ;;  %p1836_p11 = scmp.lt.u32.totalorder %s1829_s17, %s2488_s3 }
  0x34   : > { %p1832_p5 = pnand %p1830_p4, %p1803_p3 }
  0x36   : > { %p1833_p6 = pneg %p1832_p5 }
  0x38   : > { %p1838_p12 = pnand %p1836_p11, %p1833_p6 }
  0x3a   : > { %1841 = shalt.err (!%p1838_p12)
}
  0x3b   : > { %s1842_s9 = scalar_lea.vmem %s2072_s12, 2048  ;;  %p1850_p8 = scmp.lt.s32.totalorder %s2072_s12, %s2072_s12 }
  0x3c   : > { %p1843_p13 = scmp.ne.s32.totalorder %s2072_s12, %s1842_s9  ;;  %p1851_p9 = scmp.lt.s32.totalorder %s1842_s9, %s1842_s9 }
  0x3e   : > { %p1845_p0 = pnand %p1843_p13, %p1803_p3  ;;  %p1852_p10 = por %p1851_p9, %p1850_p8 }
  0x40   : > { %p1846_p7 = pneg %p1845_p0 }
  0x42   : > { %p1853_p1 = pnand %p1852_p10, %p1846_p7 }
  0x44   : > { %1856 = shalt.err (!%p1853_p1)
}
  0x45   : > { %s1961_s27 = smov 64   ;;  %s1962_s8 = smov 4  }
  0x46   : > { %1708 = dma.hbm_to_vmem [thread:$0]  (!%p2068_p2), %s2488_s3, 2048, %s2072_s12, [#allocation6], %s1961_s27, %s1961_s27, %s1962_s8  }
  0x47   : > { %p1417_p4 = scmp.ge.s32.totalorder %s1955_s21, 2 }
  0x48   : > { %p2501_p3 = scmp.ne.s32.totalorder (!%p1417_p4), %s2495_s28, 0 }
  0x49   : > { %204 = sbr.rel (%p1417_p4) target bundleno = 115 (0x73), region = 32 }
  0x50   : > { %207 = sbr.rel (!%p2501_p3) target bundleno = 115 (0x73), region = 36  ;;  %s208_s14 = sand.u32 (%p2501_p3), 1, %s1951_s20  }
  0x51   : > { %s213_s15 = smul.u32 (%p2501_p3), 38, %s1955_s21  ;;  %s2131_s23 = scalar_lea.sflag (%p2501_p3), [#allocation3], %s208_s14 }
  0x52   : > { %s1689_s16 = smul.u32 (%p2501_p3), 304, %s208_s14 }
  0x53   : > { %s214_s17 = ssub.s32 (%p2501_p3), 75, %s213_s15 }
  0x54   : > { %p215_p5 = scmp.lt.s32.totalorder (%p2501_p3), %s214_s17, 38  ;;  %s212_s25 = scalar_lea.vmem (%p2501_p3), [#allocation2], %s1689_s16 }
  0x57   : > { %s2514_s17 = smov (!%p215_p5, %s214_s17), 38 }
  0x58   : > { %s2128_s10 = sshll.u32 %s2514_s17, 7 }
  0x59   : > { %s219_s12 = ssub.s32 4864, %s2128_s10 }
  0x5a   : > { %220 = vsyncadd %s2131_s23, %s219_s12  ;;  %p1419_p2 = scmp.ne.s32.totalorder %s2128_s10, 0  ;;  %s1504_s28 = smul.u32 4864, %s1955_s21 }
  0x5b   : > { %s225_s26 = sshll.u32 %s212_s25, 4  ;;  %s1861_s15 = scalar_lea.hbm %s2485_s0, 9600  ;;  %s2141_s26 = int_to_ptr.vmem [resolvable:$true] %s225_s26 }
  0x5c   : > { %s2139_s8 = scalar_lea.hbm %s2485_s0, %s1504_s28 }
  0x5d   : > { %s1857_s11 = scalar_lea.hbm %s2139_s8, %s2128_s10  ;;  %p1862_p13 = scmp.lt.u32.totalorder %s2139_s8, %s2485_s0 }
  0x5e   : > { %p1858_p6 = scmp.ne.s32.totalorder %s2139_s8, %s1857_s11  ;;  %p1863_p0 = scmp.lt.u32.totalorder %s1861_s15, %s1857_s11 }
  0x5f   : > { %p1865_p8 = scmp.lt.u32.totalorder %s1857_s11, %s2139_s8 }
  0x60   : > { %p1859_p11 = pnand %p1858_p6, %p1419_p2  ;;  %p1864_p7 = por %p1863_p0, %p1862_p13 }
  0x62   : > { %p1860_p12 = pneg %p1859_p11  ;;  %p1866_p9 = por %p1865_p8, %p1864_p7 }
  0x64   : > { %p1867_p10 = pnand %p1866_p9, %p1860_p12 }
  0x66   : > { %1870 = shalt.err (!%p1867_p10)
}
  0x67   : > { %s1871_s12 = scalar_lea.vmem %s2141_s26, %s2128_s10  ;;  %s1963_s25 = smov [#allocation2]  }
  0x68   : > { %p1872_p1 = scmp.ne.s32.totalorder %s2141_s26, %s1871_s12  ;;  %s1875_s28 = sshll.u32 %s1963_s25, 4  ;;  %s1876_s28 = int_to_ptr.vmem [resolvable:$false] %s1875_s28 }
  0x69   : > { %s1877_s9 = scalar_lea.vmem %s1876_s28, 9728  ;;  %p1878_p6 = scmp.lt.s32.totalorder %s2141_s26, %s1876_s28 }
  0x6a   : > { %p1873_p3 = pnand %p1872_p1, %p1419_p2  ;;  %p1879_p11 = scmp.lt.s32.totalorder %s1877_s9, %s1871_s12 }
  0x6c   : > { %p1874_p5 = pneg %p1873_p3  ;;  %p1880_p13 = por %p1879_p11, %p1878_p6 }
  0x6e   : > { %p1881_p0 = pnand %p1880_p13, %p1874_p5 }
  0x70   : > { %1884 = shalt.err (!%p1881_p0)
}
  0x71   : > { %s1964_s27 = smov 128   ;;  %s1965_s11 = smov 8  }
  0x72   : > { %231 = dma.hbm_to_vmem [thread:$0]  (%p1419_p2), %s2139_s8, %s2128_s10, %s2141_s26, %s2131_s23, %s1964_s27, %s1964_s27, %s1965_s11  }
  0x73 PF: > { %p2502_p12 = scmp.ne.s32.totalorder %s2499_s7, 0 }
  0x74   : > { %s2171_s13 = sand.u32 (!%p2502_p12), 1, %s1947_s19   ;;  %p2503_p7 = scmp.ne.s32.totalorder (!%p2502_p12), %s2496_s29, 0 }
  0x75   : > { %237 = sbr.rel (%p2502_p12) target bundleno = 775 (0x307), region = 40  ;;  %s240_s15 = scalar_lea.sflag (!%p2502_p12), [#allocation3], %s2171_s13 }
  0x76   : > { %s1690_s14 = smul.u32 (!%p2502_p12), 304, %s2171_s13 }
  0x78   : > { %s2175_s16 = scalar_lea.vmem (!%p2502_p12), [#allocation2], %s1690_s14 }
  0x7c   : > { %1930 = dma.done.wait (%p2503_p7), %s240_s15, 4864  }
  0x7d   : > { %1932 = vsyncadd (%p2503_p7), %s240_s15, 4294962432  ;;  %p2504_p2 = scmp.eq.s32.totalorder %s2021_s22, 0 }
  0x7f   : > { %1934 = dma.done.wait (%p2504_p2), [#allocation6], 4096   ;;  %p2505_p8 = pmov %p2504_p2 }
  0x80   : > { %v1966_v0 = vmov 0   ;;  %v1761_v1 = vld [vmem:[#allocation5 + $0x4] ss:$8 sps:$4 sm:$0xff]   ;;  %v1763_v2 = vld [vmem:[#allocation5] ss:$8 sps:$4 sm:$0xff]   ;;  %v1787_v31 = vld [vmem:[#allocation7 + $0x10] sm:$0xff]  }
  0x81   : > { %1936 = vsyncadd (%p2505_p8), [#allocation6], 4294963200  ;;  %486 = vmatprep.mubr.bf16.mxu0 %v1966_v0  ;;  %1657 = vmatprep.subr.bf16.mxu1 %v1966_v0  ;;  %v1764_v3 = vld [vmem:[#allocation5 + $0x14] ss:$8 sps:$4 sm:$0xff]   ;;  %v1766_v4 = vld [vmem:[#allocation5 + $0x10] ss:$8 sps:$4 sm:$0xff]  }
  0x82   : > { %454 = vmatprep.subr.bf16.mxu0 %v1761_v1  ;;  %v1767_v5 = vld [vmem:[#allocation5 + $0x24] ss:$8 sps:$4 sm:$0xff]   ;;  %v1769_v6 = vld [vmem:[#allocation5 + $0x20] ss:$8 sps:$4 sm:$0xff]   ;;  %v1770_v7 = vld [vmem:[#allocation5 + $0x34] ss:$8 sps:$4 sm:$0xff]  }
  0x83   : > { %455 = vmatpush1.bf16.msra.mxu0 %v1763_v2  ;;  %v1772_v8 = vld [vmem:[#allocation5 + $0x30] ss:$8 sps:$4 sm:$0xff]   ;;  %v1773_v9 = vld [vmem:[#allocation5 + $0x44] ss:$8 sps:$4 sm:$0xff]   ;;  %v1775_v10 = vld [vmem:[#allocation5 + $0x40] ss:$8 sps:$4 sm:$0xff]  }
  0x84   : > { %456 = vmatprep.subr.bf16.mxu0 %v1764_v3  ;;  %v1776_v11 = vld [vmem:[#allocation5 + $0x54] ss:$8 sps:$4 sm:$0xff]   ;;  %v1778_v12 = vld [vmem:[#allocation5 + $0x50] ss:$8 sps:$4 sm:$0xff]   ;;  %v1779_v13 = vld [vmem:[#allocation5 + $0x64] ss:$8 sps:$4 sm:$0xff]  }
  0x85   : > { %v1781_v14 = vld [vmem:[#allocation5 + $0x60] ss:$8 sps:$4 sm:$0xff]   ;;  %v1782_v15 = vld [vmem:[#allocation5 + $0x74] ss:$8 sps:$4 sm:$0xff]   ;;  %v1784_v16 = vld [vmem:[#allocation5 + $0x70] ss:$8 sps:$4 sm:$0xff]  }
  0x86   : > { %v289_v17 = vld [vmem:[%s2175_s16] sm:$0xff]  ;;  %v290_v18 = vld [vmem:[%s2175_s16 + $0x8] sm:$0xff]  ;;  %v291_v20 = vld [vmem:[%s2175_s16 + $0x10] sm:$0xff]  ;;  %s1691_s26 = smul.u32 152, %s2171_s13  ;;  %s1302_s17 = scalar_lea.sflag [#allocation4], %s2171_s13 }
  0x87   : > { %457 = vmatpush1.bf16.msra.mxu0 %v1766_v4  ;;  %v327_v19 = vpack.c.bf16 %v290_v18, %v289_v17  ;;  %v292_v21 = vld [vmem:[%s2175_s16 + $0x18] sm:$0xff]  ;;  %v293_v23 = vld [vmem:[%s2175_s16 + $0x20] sm:$0xff]  ;;  %v294_v24 = vld [vmem:[%s2175_s16 + $0x28] sm:$0xff]  ;;  %p2506_p9 = scmp.ne.s32.totalorder %s2497_s30, 0 }
  0x88   : > { %458 = vmatprep.subr.bf16.mxu0 %v1767_v5  ;;  %v328_v22 = vpack.c.bf16 %v292_v21, %v291_v20  ;;  %v329_v25 = vpack.c.bf16 %v294_v24, %v293_v23  ;;  %v1785_v26 = vld [vmem:[#allocation7] sm:$0xff]   ;;  %v296_v28 = vld [vmem:[%s2175_s16 + $0x38] sm:$0xff]  ;;  %v298_v33 = vld [vmem:[%s2175_s16 + $0x48] sm:$0xff]  ;;  %s2365_s8 = scalar_lea.vmem [#allocation8], %s1691_s26  ;;  %s1309_s12 = smul.u32 (%p2506_p9), 38, %s2021_s22 }
  0x89   : > { %v295_v27 = vld [vmem:[%s2175_s16 + $0x30] sm:$0xff]  ;;  %v1786_v29 = vld [vmem:[#allocation7 + $0x8] sm:$0xff]   ;;  %1673 = vmatpush1.bf16.msra.mxu1 %v1785_v26  ;;  %v297_v32 = vld [vmem:[%s2175_s16 + $0x40] sm:$0xff] }
  0x8a   : > { %1658 = vmatprep.subr.bf16.mxu1 %v1966_v0  ;;  %v330_v30 = vpack.c.bf16 %v296_v28, %v295_v27  ;;  %v1788_v34 = vld [vmem:[#allocation7 + $0x18] sm:$0xff]   ;;  %v331_v35 = vpack.c.bf16 %v298_v33, %v297_v32  ;;  %v1789_v36 = vld [vmem:[#allocation7 + $0x20] sm:$0xff]   ;;  %v1790_v39 = vld [vmem:[#allocation7 + $0x28] sm:$0xff]   ;;  %v364_v27 = vlaneseq  ;;  %s1310_s25 = ssub.s32 (%p2506_p9), 75, %s1309_s12 }
  0x8b   : > { %459 = vmatpush1.bf16.msra.mxu0 %v1769_v6  ;;  %v299_v37 = vld [vmem:[%s2175_s16 + $0x50] sm:$0xff]  ;;  %v300_v38 = vld [vmem:[%s2175_s16 + $0x58] sm:$0xff]  ;;  %v301_v42 = vld [vmem:[%s2175_s16 + $0x60] sm:$0xff]  ;;  %p1311_p10 = scmp.lt.s32.totalorder (%p2506_p9), %s1310_s25, 38 }
  0x8c   : > { %460 = vmatprep.subr.bf16.mxu0 %v1770_v7  ;;  %v332_v40 = vpack.c.bf16 %v300_v38, %v299_v37  ;;  %v1791_v41 = vld [vmem:[#allocation7 + $0x30] sm:$0xff]   ;;  %v302_v43 = vld [vmem:[%s2175_s16 + $0x68] sm:$0xff]  ;;  %v1793_v46 = vld [vmem:[#allocation7 + $0x40] sm:$0xff]   ;;  %v365_v28 = vshrl.u32 %v364_v27, 7 }
  0x8d   : > { %1674 = vmatpush1.bf16.msra.mxu1 %v1786_v29  ;;  %v1792_v44 = vld [vmem:[#allocation7 + $0x38] sm:$0xff]   ;;  %v333_v45 = vpack.c.bf16 %v302_v43, %v301_v42  ;;  %v303_v47 = vld [vmem:[%s2175_s16 + $0x70] sm:$0xff]  ;;  %v1794_v49 = vld [vmem:[#allocation7 + $0x48] sm:$0xff]  }
  0x8e   : > { %1659 = vmatprep.subr.bf16.mxu1 %v1966_v0  ;;  %v304_v48 = vld [vmem:[%s2175_s16 + $0x78] sm:$0xff]  ;;  %v1795_v51 = vld [vmem:[#allocation7 + $0x50] sm:$0xff]   ;;  %v306_v53 = vld [vmem:[%s2175_s16 + $0x88] sm:$0xff] }
  0x8f   : > { %461 = vmatpush1.bf16.msra.mxu0 %v1772_v8  ;;  %v334_v50 = vpack.c.bf16 %v304_v48, %v303_v47  ;;  %v305_v52 = vld [vmem:[%s2175_s16 + $0x80] sm:$0xff]  ;;  %v1796_v54 = vld [vmem:[#allocation7 + $0x58] sm:$0xff]   ;;  %v307_v57 = vld [vmem:[%s2175_s16 + $0x90] sm:$0xff] }
  0x90   : > { %462 = vmatprep.subr.bf16.mxu0 %v1773_v9  ;;  %v335_v55 = vpack.c.bf16 %v306_v53, %v305_v52  ;;  %v1797_v56 = vld [vmem:[#allocation7 + $0x60] sm:$0xff]   ;;  %v308_v58 = vld [vmem:[%s2175_s16 + $0x98] sm:$0xff]  ;;  %v310_v61 = vld [vmem:[%s2175_s16 + $0xa8] sm:$0xff] }
  0x91   : > { %1675 = vmatpush1.bf16.msra.mxu1 %v1787_v31  ;;  %v336_v59 = vpack.c.bf16 %v308_v58, %v307_v57  ;;  %v309_v60 = vld [vmem:[%s2175_s16 + $0xa0] sm:$0xff]  ;;  %v311_v63 = vld [vmem:[%s2175_s16 + $0xb0] sm:$0xff]  ;;  %v312_v1 = vld [vmem:[%s2175_s16 + $0xb8] sm:$0xff] }
  0x92   : > { %1660 = vmatprep.subr.bf16.mxu1 %v1966_v0  ;;  %v337_v62 = vpack.c.bf16 %v310_v61, %v309_v60  ;;  %v1798_v2 = vld [vmem:[#allocation7 + $0x68] sm:$0xff]   ;;  %v338_v3 = vpack.c.bf16 %v312_v1, %v311_v63  ;;  %v1799_v4 = vld [vmem:[#allocation7 + $0x70] sm:$0xff]   ;;  %v1800_v7 = vld [vmem:[#allocation7 + $0x78] sm:$0xff]  }
  0x93   : > { %463 = vmatpush1.bf16.msra.mxu0 %v1775_v10  ;;  %v313_v5 = vld [vmem:[%s2175_s16 + $0xc0] sm:$0xff]  ;;  %v314_v6 = vld [vmem:[%s2175_s16 + $0xc8] sm:$0xff]  ;;  %v315_v9 = vld [vmem:[%s2175_s16 + $0xd0] sm:$0xff] }
  0x94   : > { %464 = vmatprep.subr.bf16.mxu0 %v1776_v11  ;;  %v339_v8 = vpack.c.bf16 %v314_v6, %v313_v5  ;;  %v316_v10 = vld [vmem:[%s2175_s16 + $0xd8] sm:$0xff]  ;;  %v321_v18 = vld [vmem:[%s2175_s16 + $0x100] sm:$0xff]  ;;  %v323_v21 = vld [vmem:[%s2175_s16 + $0x110] sm:$0xff] }
  0x95   : > { %1676 = vmatpush1.bf16.msra.mxu1 %v1788_v34  ;;  %v340_v11 = vpack.c.bf16 %v316_v10, %v315_v9  ;;  %v325_v24 = vld [vmem:[%s2175_s16 + $0x120] sm:$0xff] }
  0x96   : > { %1661 = vmatprep.subr.bf16.mxu1 %v1966_v0 }
  0x97   : > { %465 = vmatpush1.bf16.msra.mxu0 %v1778_v12  ;;  %v317_v12 = vld [vmem:[%s2175_s16 + $0xe0] sm:$0xff] }
  0x98   : > { %466 = vmatprep.subr.bf16.mxu0 %v1779_v13  ;;  %v318_v13 = vld [vmem:[%s2175_s16 + $0xe8] sm:$0xff] }
  0x99   : > { %1677 = vmatpush1.bf16.msra.mxu1 %v1789_v36 }
  0x9a   : > { %1662 = vmatprep.subr.bf16.mxu1 %v1966_v0 }
  0x9b   : > { %467 = vmatpush1.bf16.msra.mxu0 %v1781_v14  ;;  %v341_v14 = vpack.c.bf16 %v318_v13, %v317_v12 }
  0x9c   : > { %468 = vmatprep.subr.bf16.mxu0 %v1782_v15  ;;  %v319_v15 = vld [vmem:[%s2175_s16 + $0xf0] sm:$0xff] }
  0x9d   : > { %1678 = vmatpush1.bf16.msra.mxu1 %v1790_v39 }
  0x9e   : > { %1663 = vmatprep.subr.bf16.mxu1 %v1966_v0 }
  0x9f   : > { %469 = vmatpush1.bf16.msra.mxu0 %v1784_v16  ;;  %v320_v16 = vld [vmem:[%s2175_s16 + $0xf8] sm:$0xff] }
  0xa0   : > { %926 = vmatprep.subr.bf16.mxu0 %v1966_v0  ;;  %v342_v17 = vpack.c.bf16 %v320_v16, %v319_v15 }
  0xa1   : > { %1679 = vmatpush1.bf16.msra.mxu1 %v1791_v41 }
  0xa2   : > { %487 = vmatmul.mubr.bf16.vlgmr.msra.gmra.mrb[0].mxu0 %v327_v19  ;;  %1664 = vmatprep.subr.bf16.mxu1 %v1966_v0  ;;  %v322_v19 = vld [vmem:[%s2175_s16 + $0x108] sm:$0xff] }
  0xa3   : > { %496 = vmatprep.mubr.bf16.mxu0 %v1966_v0  ;;  %927 = vmatpush1.bf16.msra.mxu0 %v1785_v26  ;;  %v343_v20 = vpack.c.bf16 %v322_v19, %v321_v18 }
  0xa4   : > { %928 = vmatprep.subr.bf16.mxu0 %v1966_v0 }
  0xa5   : > { %1680 = vmatpush1.bf16.msra.mxu1 %v1792_v44 }
  0xa6   : > { %1665 = vmatprep.subr.bf16.mxu1 %v1966_v0 }
  0xa7   : > { %929 = vmatpush1.bf16.msra.mxu0 %v1786_v29  ;;  %v366_v29 = vsub.s32 0, %v365_v28 }
  0xa8   : > { %930 = vmatprep.subr.bf16.mxu0 %v1966_v0 }
  0xa9   : > { %1681 = vmatpush1.bf16.msra.mxu1 %v1793_v46 }
  0xaa   : > { %497 = vmatmul.mubr.bf16.gmra.mrb[4].mxu0 %v328_v22  ;;  %1666 = vmatprep.subr.bf16.mxu1 %v1966_v0  ;;  %v324_v22 = vld [vmem:[%s2175_s16 + $0x118] sm:$0xff] }
  0xab   : > { %506 = vmatprep.mubr.bf16.mxu0 %v1966_v0  ;;  %931 = vmatpush1.bf16.msra.mxu0 %v1787_v31  ;;  %v344_v23 = vpack.c.bf16 %v324_v22, %v323_v21  ;;  %v370_v31 = vsub.s32 1, %v365_v28 }
  0xac   : > { %932 = vmatprep.subr.bf16.mxu0 %v1966_v0 }
  0xad   : > { %1682 = vmatpush1.bf16.msra.mxu1 %v1794_v49 }
  0xae   : > { %1667 = vmatprep.subr.bf16.mxu1 %v1966_v0 }
  0xaf   : > { %933 = vmatpush1.bf16.msra.mxu0 %v1788_v34 }
  0xb0   : > { %934 = vmatprep.subr.bf16.mxu0 %v1966_v0 }
  0xb1   : > { %1683 = vmatpush1.bf16.msra.mxu1 %v1795_v51 }
  0xb2   : > { %507 = vmatmul.mubr.bf16.gmra.mrb[8].mxu0 %v329_v25  ;;  %1668 = vmatprep.subr.bf16.mxu1 %v1966_v0  ;;  %v326_v25 = vld [vmem:[%s2175_s16 + $0x128] sm:$0xff] }
  0xb3   : > { %516 = vmatprep.mubr.bf16.mxu0 %v1966_v0  ;;  %935 = vmatpush1.bf16.msra.mxu0 %v1789_v36  ;;  %v345_v26 = vpack.c.bf16 %v326_v25, %v325_v24 }
  0xb4   : > { %936 = vmatprep.subr.bf16.mxu0 %v1966_v0 }
  0xb5   : > { %1684 = vmatpush1.bf16.msra.mxu1 %v1796_v54 }
  0xb6   : > { %1669 = vmatprep.subr.bf16.mxu1 %v1966_v0 }
  0xb7   : > { %937 = vmatpush1.bf16.msra.mxu0 %v1790_v39 }
  0xb8   : > { %938 = vmatprep.subr.bf16.mxu0 %v1966_v0 }
  0xb9   : > { %1685 = vmatpush1.bf16.msra.mxu1 %v1797_v56 }
  0xba   : > { %517 = vmatmul.mubr.bf16.gmra.mrb[12].mxu0 %v330_v30  ;;  %1670 = vmatprep.subr.bf16.mxu1 %v1966_v0  ;;  %v362_v30 = vld [vmem:[%s2487_s2] sm:$0x3] }
  0xbb   : > { %526 = vmatprep.mubr.bf16.mxu0 %v1966_v0  ;;  %939 = vmatpush1.bf16.msra.mxu0 %v1791_v41  ;;  %v2277_v32 = vrot.slane %v362_v30, %v366_v29  ;;  %v2279_v33 = vrot.slane %v362_v30, %v370_v31 }
  0xbc   : > { %940 = vmatprep.subr.bf16.mxu0 %v1966_v0 }
  0xbd   : > { %1686 = vmatpush1.bf16.msra.mxu1 %v1798_v2 }
  0xbe   : > { %1671 = vmatprep.subr.bf16.mxu1 %v1966_v0 }
  0xbf   : > { %941 = vmatpush1.bf16.msra.mxu0 %v1792_v44 }
  0xc0   : > { %942 = vmatprep.subr.bf16.mxu0 %v1966_v0 }
  0xc1   : > { %1687 = vmatpush1.bf16.msra.mxu1 %v1799_v4 }
  0xc2   : > { %527 = vmatmul.mubr.bf16.gmra.mrb[16].mxu0 %v331_v35  ;;  %1672 = vmatprep.subr.bf16.mxu1 %v1966_v0 }
  0xc3   : > { %536 = vmatprep.mubr.bf16.mxu0 %v1966_v0  ;;  %943 = vmatpush1.bf16.msra.mxu0 %v1793_v46 }
  0xc4   : > { %944 = vmatprep.subr.bf16.mxu0 %v1966_v0 }
  0xc5   : > { %1688 = vmatpush1.bf16.msra.mxu1 %v1800_v7 }
  0xc7   : > { %945 = vmatpush1.bf16.msra.mxu0 %v1794_v49 }
  0xc8   : > { %946 = vmatprep.subr.bf16.mxu0 %v1966_v0 }
  0xca   : > { %537 = vmatmul.mubr.bf16.gmra.mrb[20].mxu0 %v332_v40 }
  0xcb   : > { %546 = vmatprep.mubr.bf16.mxu0 %v1966_v0  ;;  %947 = vmatpush1.bf16.msra.mxu0 %v1795_v51 }
  0xcc   : > { %948 = vmatprep.subr.bf16.mxu0 %v1966_v0 }
  0xcf   : > { %949 = vmatpush1.bf16.msra.mxu0 %v1796_v54 }
  0xd0   : > { %950 = vmatprep.subr.bf16.mxu0 %v1966_v0 }
  0xd2   : > { %547 = vmatmul.mubr.bf16.gmra.mrb[24].mxu0 %v333_v45 }
  0xd3   : > { %556 = vmatprep.mubr.bf16.mxu0 %v1966_v0  ;;  %951 = vmatpush1.bf16.msra.mxu0 %v1797_v56 }
  0xd4   : > { %952 = vmatprep.subr.bf16.mxu0 %v1966_v0 }
  0xd7   : > { %953 = vmatpush1.bf16.msra.mxu0 %v1798_v2 }
  0xd8   : > { %954 = vmatprep.subr.bf16.mxu0 %v1966_v0 }
  0xda   : > { %557 = vmatmul.mubr.bf16.gmra.mrb[28].mxu0 %v334_v50 }
  0xdb   : > { %566 = vmatprep.mubr.bf16.mxu0 %v1966_v0  ;;  %955 = vmatpush1.bf16.msra.mxu0 %v1799_v4 }
  0xdc   : > { %956 = vmatprep.subr.bf16.mxu0 %v1966_v0 }
  0xdf   : > { %957 = vmatpush1.bf16.msra.mxu0 %v1800_v7 }
  0xe2   : > { %567 = vmatmul.mubr.bf16.gmra.mrb[32].mxu0 %v335_v55 }
  0xe3   : > { %576 = vmatprep.mubr.bf16.mxu0 %v1966_v0 }
  0xea   : > { %577 = vmatmul.mubr.bf16.gmra.mrb[36].mxu0 %v336_v59 }
  0xeb   : > { %586 = vmatprep.mubr.bf16.mxu0 %v1966_v0 }
  0xf2   : > { %587 = vmatmul.mubr.bf16.gmra.mrb[40].mxu0 %v337_v62 }
  0xf3   : > { %596 = vmatprep.mubr.bf16.mxu0 %v1966_v0 }
  0xfa   : > { %597 = vmatmul.mubr.bf16.gmra.mrb[44].mxu0 %v338_v3 }
  0xfb   : > { %606 = vmatprep.mubr.bf16.mxu0 %v1966_v0 }
 0x102   : > { %607 = vmatmul.mubr.bf16.gmra.mrb[48].mxu0 %v339_v8 }
 0x103   : > { %616 = vmatprep.mubr.bf16.mxu0 %v1966_v0 }
 0x10a   : > { %617 = vmatmul.mubr.bf16.gmra.mrb[52].mxu0 %v340_v11 }
 0x10b   : > { %626 = vmatprep.mubr.bf16.mxu0 %v1966_v0 }
 0x112   : > { %627 = vmatmul.mubr.bf16.gmra.mrb[56].mxu0 %v341_v14 }
 0x113   : > { %636 = vmatprep.mubr.bf16.mxu0 %v1966_v0 }
 0x11a   : > { %637 = vmatmul.mubr.bf16.gmra.mrb[60].mxu0 %v342_v17 }
 0x11b   : > { %646 = vmatprep.mubr.bf16.mxu0 %v1966_v0 }
 0x122   : > { %647 = vmatmul.mubr.bf16.gmra.mrb[64].mxu0 %v343_v20 }
 0x123   : > { %656 = vmatprep.mubr.bf16.mxu0 %v1966_v0 }
 0x12a   : > { %657 = vmatmul.mubr.bf16.gmra.mrb[68].mxu0 %v344_v23 }
 0x12b   : > { %666 = vmatprep.mubr.bf16.mxu0 %v1966_v0 }
 0x132   : > { %667 = vmatmul.mubr.bf16.gmra.mrb[72].mxu0 %v345_v26 }
 0x175   : > { %v488_v34 = vpop.f32.mrb[0].mxu0 }
 0x176   : > { %v489_v35 = vadd.f32 %v488_v34, %v2277_v32  ;;  %v490_v0 = vpop.f32.mrb[1].mxu0 }
 0x177   : > { %v491_v36 = vadd.f32 %v490_v0, %v2279_v33  ;;  %v492_v37 = vpop.f32.mrb[2].mxu0 }
 0x178   : > { %v493_v38 = vadd.f32 %v492_v37, %v2277_v32  ;;  %v494_v39 = vpop.f32.mrb[3].mxu0  ;;  %v677_v41 = vmax.f32 %v489_v35, 0.0 }
 0x179   : > { %v495_v40 = vadd.f32 %v494_v39, %v2279_v33  ;;  %v678_v43 = vmax.f32 %v491_v36, 0.0 }
 0x17a   : > { %v679_v42 = vmax.f32 %v493_v38, 0.0 }
 0x17b   : > { %v680_v44 = vmax.f32 %v495_v40, 0.0 }
 0x17c   : > { %v753_v45 = vpack.c.bf16 %v679_v42, %v677_v41 }
 0x17d   : > { %v754_v46 = vpack.c.bf16 %v680_v44, %v678_v43  ;;  %v498_v47 = vpop.f32.mrb[4].mxu0 }
 0x17e   : > { %v499_v48 = vadd.f32 %v498_v47, %v2277_v32  ;;  %v500_v49 = vpop.f32.mrb[5].mxu0 }
 0x17f   : > { %v501_v50 = vadd.f32 %v500_v49, %v2279_v33  ;;  %v502_v51 = vpop.f32.mrb[6].mxu0  ;;  %958 = vmatprep.mubr.bf16.mxu0 %v754_v46 }
 0x180   : > { %v503_v52 = vadd.f32 %v502_v51, %v2277_v32  ;;  %v504_v53 = vpop.f32.mrb[7].mxu0  ;;  %959 = vmatmul.mubr.bf16.vlgmr.msra.gmra.mrb[76].mxu0 %v753_v45  ;;  %v681_v55 = vmax.f32 %v499_v48, 0.0 }
 0x181   : > { %v505_v54 = vadd.f32 %v504_v53, %v2279_v33  ;;  %v682_v57 = vmax.f32 %v501_v50, 0.0 }
 0x182   : > { %v683_v56 = vmax.f32 %v503_v52, 0.0 }
 0x183   : > { %v684_v58 = vmax.f32 %v505_v54, 0.0 }
 0x184   : > { %v755_v59 = vpack.c.bf16 %v683_v56, %v681_v55 }
 0x185   : > { %v756_v60 = vpack.c.bf16 %v684_v58, %v682_v57  ;;  %v508_v61 = vpop.f32.mrb[8].mxu0 }
 0x186   : > { %v509_v62 = vadd.f32 %v508_v61, %v2277_v32  ;;  %v510_v63 = vpop.f32.mrb[9].mxu0 }
 0x187   : > { %v511_v1 = vadd.f32 %v510_v63, %v2279_v33  ;;  %v512_v2 = vpop.f32.mrb[10].mxu0  ;;  %966 = vmatprep.mubr.bf16.mxu0 %v756_v60 }
 0x188   : > { %v513_v3 = vadd.f32 %v512_v2, %v2277_v32  ;;  %v514_v4 = vpop.f32.mrb[11].mxu0  ;;  %967 = vmatmul.mubr.bf16.gmra.mrb[80].mxu0 %v755_v59  ;;  %v685_v6 = vmax.f32 %v509_v62, 0.0 }
 0x189   : > { %v515_v5 = vadd.f32 %v514_v4, %v2279_v33  ;;  %v686_v8 = vmax.f32 %v511_v1, 0.0 }
 0x18a   : > { %v687_v7 = vmax.f32 %v513_v3, 0.0 }
 0x18b   : > { %v688_v9 = vmax.f32 %v515_v5, 0.0 }
 0x18c   : > { %v757_v10 = vpack.c.bf16 %v687_v7, %v685_v6 }
 0x18d   : > { %v518_v11 = vpop.f32.mrb[12].mxu0  ;;  %v758_v12 = vpack.c.bf16 %v688_v9, %v686_v8 }
 0x18e   : > { %v519_v13 = vadd.f32 %v518_v11, %v2277_v32  ;;  %v520_v14 = vpop.f32.mrb[13].mxu0 }
 0x18f   : > { %v521_v15 = vadd.f32 %v520_v14, %v2279_v33  ;;  %v522_v16 = vpop.f32.mrb[14].mxu0  ;;  %974 = vmatprep.mubr.bf16.mxu1 %v758_v12 }
 0x190   : > { %v523_v17 = vadd.f32 %v522_v16, %v2277_v32  ;;  %v524_v18 = vpop.f32.mrb[15].mxu0  ;;  %975 = vmatmul.mubr.bf16.vlgmr.msra.gmra.mrb[0].mxu1 %v757_v10  ;;  %v689_v20 = vmax.f32 %v519_v13, 0.0 }
 0x191   : > { %v525_v19 = vadd.f32 %v524_v18, %v2279_v33  ;;  %v690_v22 = vmax.f32 %v521_v15, 0.0 }
 0x192   : > { %v691_v21 = vmax.f32 %v523_v17, 0.0 }
 0x193   : > { %v692_v23 = vmax.f32 %v525_v19, 0.0 }
 0x194   : > { %v759_v24 = vpack.c.bf16 %v691_v21, %v689_v20 }
 0x195   : > { %v760_v25 = vpack.c.bf16 %v692_v23, %v690_v22  ;;  %v528_v26 = vpop.f32.mrb[16].mxu0 }
 0x196   : > { %v529_v27 = vadd.f32 %v528_v26, %v2277_v32  ;;  %v530_v28 = vpop.f32.mrb[17].mxu0 }
 0x197   : > { %v531_v29 = vadd.f32 %v530_v28, %v2279_v33  ;;  %v532_v30 = vpop.f32.mrb[18].mxu0  ;;  %982 = vmatprep.mubr.bf16.mxu1 %v760_v25 }
 0x198   : > { %v533_v31 = vadd.f32 %v532_v30, %v2277_v32  ;;  %v534_v34 = vpop.f32.mrb[19].mxu0  ;;  %983 = vmatmul.mubr.bf16.gmra.mrb[4].mxu1 %v759_v24  ;;  %v693_v0 = vmax.f32 %v529_v27, 0.0 }
 0x199   : > { %v535_v35 = vadd.f32 %v534_v34, %v2279_v33  ;;  %v694_v37 = vmax.f32 %v531_v29, 0.0 }
 0x19a   : > { %v695_v36 = vmax.f32 %v533_v31, 0.0 }
 0x19b   : > { %v696_v38 = vmax.f32 %v535_v35, 0.0 }
 0x19c   : > { %v761_v39 = vpack.c.bf16 %v695_v36, %v693_v0 }
 0x19d   : > { %v762_v40 = vpack.c.bf16 %v696_v38, %v694_v37  ;;  %v538_v41 = vpop.f32.mrb[20].mxu0 }
 0x19e   : > { %v539_v42 = vadd.f32 %v538_v41, %v2277_v32  ;;  %v540_v43 = vpop.f32.mrb[21].mxu0 }
 0x19f   : > { %v541_v44 = vadd.f32 %v540_v43, %v2279_v33  ;;  %v542_v45 = vpop.f32.mrb[22].mxu0  ;;  %990 = vmatprep.mubr.bf16.mxu1 %v762_v40 }
 0x1a0   : > { %v543_v46 = vadd.f32 %v542_v45, %v2277_v32  ;;  %v544_v47 = vpop.f32.mrb[23].mxu0  ;;  %991 = vmatmul.mubr.bf16.gmra.mrb[8].mxu1 %v761_v39  ;;  %v697_v49 = vmax.f32 %v539_v42, 0.0 }
 0x1a1   : > { %v545_v48 = vadd.f32 %v544_v47, %v2279_v33  ;;  %v698_v51 = vmax.f32 %v541_v44, 0.0 }
 0x1a2   : > { %v699_v50 = vmax.f32 %v543_v46, 0.0 }
 0x1a3   : > { %v700_v52 = vmax.f32 %v545_v48, 0.0 }
 0x1a4   : > { %v763_v53 = vpack.c.bf16 %v699_v50, %v697_v49 }
 0x1a5   : > { %v764_v54 = vpack.c.bf16 %v700_v52, %v698_v51  ;;  %v548_v55 = vpop.f32.mrb[24].mxu0 }
 0x1a6   : > { %v549_v56 = vadd.f32 %v548_v55, %v2277_v32  ;;  %v550_v57 = vpop.f32.mrb[25].mxu0 }
 0x1a7   : > { %v551_v58 = vadd.f32 %v550_v57, %v2279_v33  ;;  %v552_v59 = vpop.f32.mrb[26].mxu0  ;;  %998 = vmatprep.mubr.bf16.mxu1 %v764_v54 }
 0x1a8   : > { %v553_v60 = vadd.f32 %v552_v59, %v2277_v32  ;;  %v554_v61 = vpop.f32.mrb[27].mxu0  ;;  %999 = vmatmul.mubr.bf16.gmra.mrb[12].mxu1 %v763_v53  ;;  %v701_v63 = vmax.f32 %v549_v56, 0.0 }
 0x1a9   : > { %v555_v62 = vadd.f32 %v554_v61, %v2279_v33  ;;  %v702_v2 = vmax.f32 %v551_v58, 0.0 }
 0x1aa   : > { %v703_v1 = vmax.f32 %v553_v60, 0.0 }
 0x1ab   : > { %v704_v3 = vmax.f32 %v555_v62, 0.0 }
 0x1ac   : > { %v765_v4 = vpack.c.bf16 %v703_v1, %v701_v63 }
 0x1ad   : > { %v766_v5 = vpack.c.bf16 %v704_v3, %v702_v2  ;;  %v558_v6 = vpop.f32.mrb[28].mxu0 }
 0x1ae   : > { %v559_v7 = vadd.f32 %v558_v6, %v2277_v32  ;;  %v560_v8 = vpop.f32.mrb[29].mxu0 }
 0x1af   : > { %v561_v9 = vadd.f32 %v560_v8, %v2279_v33  ;;  %v562_v10 = vpop.f32.mrb[30].mxu0  ;;  %1006 = vmatprep.mubr.bf16.mxu1 %v766_v5 }
 0x1b0   : > { %v563_v11 = vadd.f32 %v562_v10, %v2277_v32  ;;  %v564_v12 = vpop.f32.mrb[31].mxu0  ;;  %1007 = vmatmul.mubr.bf16.gmra.mrb[16].mxu1 %v765_v4  ;;  %v705_v14 = vmax.f32 %v559_v7, 0.0 }
 0x1b1   : > { %v565_v13 = vadd.f32 %v564_v12, %v2279_v33  ;;  %v706_v16 = vmax.f32 %v561_v9, 0.0 }
 0x1b2   : > { %v707_v15 = vmax.f32 %v563_v11, 0.0 }
 0x1b3   : > { %v708_v17 = vmax.f32 %v565_v13, 0.0 }
 0x1b4   : > { %v767_v18 = vpack.c.bf16 %v707_v15, %v705_v14 }
 0x1b5   : > { %v768_v19 = vpack.c.bf16 %v708_v17, %v706_v16  ;;  %v568_v20 = vpop.f32.mrb[32].mxu0 }
 0x1b6   : > { %v569_v21 = vadd.f32 %v568_v20, %v2277_v32  ;;  %v570_v22 = vpop.f32.mrb[33].mxu0 }
 0x1b7   : > { %v571_v23 = vadd.f32 %v570_v22, %v2279_v33  ;;  %v572_v24 = vpop.f32.mrb[34].mxu0  ;;  %1014 = vmatprep.mubr.bf16.mxu1 %v768_v19 }
 0x1b8   : > { %v573_v25 = vadd.f32 %v572_v24, %v2277_v32  ;;  %v574_v26 = vpop.f32.mrb[35].mxu0  ;;  %1015 = vmatmul.mubr.bf16.gmra.mrb[20].mxu1 %v767_v18  ;;  %v709_v28 = vmax.f32 %v569_v21, 0.0 }
 0x1b9   : > { %v575_v27 = vadd.f32 %v574_v26, %v2279_v33  ;;  %v710_v30 = vmax.f32 %v571_v23, 0.0 }
 0x1ba   : > { %v711_v29 = vmax.f32 %v573_v25, 0.0 }
 0x1bb   : > { %v712_v31 = vmax.f32 %v575_v27, 0.0 }
 0x1bc   : > { %v769_v34 = vpack.c.bf16 %v711_v29, %v709_v28 }
 0x1bd   : > { %v770_v35 = vpack.c.bf16 %v712_v31, %v710_v30  ;;  %v578_v0 = vpop.f32.mrb[36].mxu0 }
 0x1be   : > { %v579_v36 = vadd.f32 %v578_v0, %v2277_v32  ;;  %v580_v37 = vpop.f32.mrb[37].mxu0 }
 0x1bf   : > { %v581_v38 = vadd.f32 %v580_v37, %v2279_v33  ;;  %v582_v39 = vpop.f32.mrb[38].mxu0  ;;  %1022 = vmatprep.mubr.bf16.mxu1 %v770_v35 }
 0x1c0   : > { %v583_v40 = vadd.f32 %v582_v39, %v2277_v32  ;;  %v584_v41 = vpop.f32.mrb[39].mxu0  ;;  %1023 = vmatmul.mubr.bf16.gmra.mrb[24].mxu1 %v769_v34  ;;  %v713_v43 = vmax.f32 %v579_v36, 0.0 }
 0x1c1   : > { %v585_v42 = vadd.f32 %v584_v41, %v2279_v33  ;;  %v714_v45 = vmax.f32 %v581_v38, 0.0 }
 0x1c2   : > { %v715_v44 = vmax.f32 %v583_v40, 0.0 }
 0x1c3   : > { %v716_v46 = vmax.f32 %v585_v42, 0.0 }
 0x1c4   : > { %v771_v47 = vpack.c.bf16 %v715_v44, %v713_v43 }
 0x1c5   : > { %v772_v48 = vpack.c.bf16 %v716_v46, %v714_v45  ;;  %v588_v49 = vpop.f32.mrb[40].mxu0 }
 0x1c6   : > { %v589_v50 = vadd.f32 %v588_v49, %v2277_v32  ;;  %v590_v51 = vpop.f32.mrb[41].mxu0 }
 0x1c7   : > { %v591_v52 = vadd.f32 %v590_v51, %v2279_v33  ;;  %v592_v53 = vpop.f32.mrb[42].mxu0  ;;  %1030 = vmatprep.mubr.bf16.mxu1 %v772_v48 }
 0x1c8   : > { %v593_v54 = vadd.f32 %v592_v53, %v2277_v32  ;;  %v594_v55 = vpop.f32.mrb[43].mxu0  ;;  %1031 = vmatmul.mubr.bf16.gmra.mrb[28].mxu1 %v771_v47  ;;  %v717_v57 = vmax.f32 %v589_v50, 0.0 }
 0x1c9   : > { %v595_v56 = vadd.f32 %v594_v55, %v2279_v33  ;;  %v718_v59 = vmax.f32 %v591_v52, 0.0 }
 0x1ca   : > { %v719_v58 = vmax.f32 %v593_v54, 0.0 }
 0x1cb   : > { %v720_v60 = vmax.f32 %v595_v56, 0.0 }
 0x1cc   : > { %v773_v61 = vpack.c.bf16 %v719_v58, %v717_v57 }
 0x1cd   : > { %v774_v62 = vpack.c.bf16 %v720_v60, %v718_v59  ;;  %v598_v63 = vpop.f32.mrb[44].mxu0 }
 0x1ce   : > { %v599_v1 = vadd.f32 %v598_v63, %v2277_v32  ;;  %v600_v2 = vpop.f32.mrb[45].mxu0 }
 0x1cf   : > { %v601_v3 = vadd.f32 %v600_v2, %v2279_v33  ;;  %v602_v4 = vpop.f32.mrb[46].mxu0  ;;  %1038 = vmatprep.mubr.bf16.mxu1 %v774_v62 }
 0x1d0   : > { %v603_v5 = vadd.f32 %v602_v4, %v2277_v32  ;;  %v604_v6 = vpop.f32.mrb[47].mxu0  ;;  %1039 = vmatmul.mubr.bf16.gmra.mrb[32].mxu1 %v773_v61  ;;  %v721_v8 = vmax.f32 %v599_v1, 0.0 }
 0x1d1   : > { %v605_v7 = vadd.f32 %v604_v6, %v2279_v33  ;;  %v722_v10 = vmax.f32 %v601_v3, 0.0 }
 0x1d2   : > { %v723_v9 = vmax.f32 %v603_v5, 0.0 }
 0x1d3   : > { %v724_v11 = vmax.f32 %v605_v7, 0.0 }
 0x1d4   : > { %v775_v12 = vpack.c.bf16 %v723_v9, %v721_v8 }
 0x1d5   : > { %v776_v13 = vpack.c.bf16 %v724_v11, %v722_v10  ;;  %v608_v14 = vpop.f32.mrb[48].mxu0 }
 0x1d6   : > { %v609_v15 = vadd.f32 %v608_v14, %v2277_v32  ;;  %v610_v16 = vpop.f32.mrb[49].mxu0 }
 0x1d7   : > { %v611_v17 = vadd.f32 %v610_v16, %v2279_v33  ;;  %v612_v18 = vpop.f32.mrb[50].mxu0  ;;  %1046 = vmatprep.mubr.bf16.mxu1 %v776_v13 }
 0x1d8   : > { %v613_v19 = vadd.f32 %v612_v18, %v2277_v32  ;;  %v614_v20 = vpop.f32.mrb[51].mxu0  ;;  %1047 = vmatmul.mubr.bf16.gmra.mrb[36].mxu1 %v775_v12  ;;  %v725_v22 = vmax.f32 %v609_v15, 0.0 }
 0x1d9   : > { %v615_v21 = vadd.f32 %v614_v20, %v2279_v33  ;;  %v726_v24 = vmax.f32 %v611_v17, 0.0 }
 0x1da   : > { %v727_v23 = vmax.f32 %v613_v19, 0.0 }
 0x1db   : > { %v728_v25 = vmax.f32 %v615_v21, 0.0 }
 0x1dc   : > { %v777_v26 = vpack.c.bf16 %v727_v23, %v725_v22 }
 0x1dd   : > { %v778_v27 = vpack.c.bf16 %v728_v25, %v726_v24  ;;  %v618_v28 = vpop.f32.mrb[52].mxu0 }
 0x1de   : > { %v619_v29 = vadd.f32 %v618_v28, %v2277_v32  ;;  %v620_v30 = vpop.f32.mrb[53].mxu0 }
 0x1df   : > { %v621_v31 = vadd.f32 %v620_v30, %v2279_v33  ;;  %v622_v34 = vpop.f32.mrb[54].mxu0  ;;  %1054 = vmatprep.mubr.bf16.mxu1 %v778_v27 }
 0x1e0   : > { %v623_v35 = vadd.f32 %v622_v34, %v2277_v32  ;;  %v624_v0 = vpop.f32.mrb[55].mxu0  ;;  %1055 = vmatmul.mubr.bf16.gmra.mrb[40].mxu1 %v777_v26  ;;  %v729_v37 = vmax.f32 %v619_v29, 0.0 }
 0x1e1   : > { %v625_v36 = vadd.f32 %v624_v0, %v2279_v33  ;;  %v730_v39 = vmax.f32 %v621_v31, 0.0 }
 0x1e2   : > { %v731_v38 = vmax.f32 %v623_v35, 0.0 }
 0x1e3   : > { %v732_v40 = vmax.f32 %v625_v36, 0.0 }
 0x1e4   : > { %v779_v41 = vpack.c.bf16 %v731_v38, %v729_v37 }
 0x1e5   : > { %v780_v42 = vpack.c.bf16 %v732_v40, %v730_v39  ;;  %v628_v43 = vpop.f32.mrb[56].mxu0 }
 0x1e6   : > { %v629_v44 = vadd.f32 %v628_v43, %v2277_v32  ;;  %v630_v45 = vpop.f32.mrb[57].mxu0 }
 0x1e7   : > { %v631_v46 = vadd.f32 %v630_v45, %v2279_v33  ;;  %v632_v47 = vpop.f32.mrb[58].mxu0  ;;  %1062 = vmatprep.mubr.bf16.mxu1 %v780_v42 }
 0x1e8   : > { %v633_v48 = vadd.f32 %v632_v47, %v2277_v32  ;;  %v634_v49 = vpop.f32.mrb[59].mxu0  ;;  %1063 = vmatmul.mubr.bf16.gmra.mrb[44].mxu1 %v779_v41  ;;  %v733_v51 = vmax.f32 %v629_v44, 0.0 }
 0x1e9   : > { %v635_v50 = vadd.f32 %v634_v49, %v2279_v33  ;;  %v734_v53 = vmax.f32 %v631_v46, 0.0 }
 0x1ea   : > { %v735_v52 = vmax.f32 %v633_v48, 0.0 }
 0x1eb   : > { %v736_v54 = vmax.f32 %v635_v50, 0.0 }
 0x1ec   : > { %v781_v55 = vpack.c.bf16 %v735_v52, %v733_v51  ;;  %v2360_v51 = vld [vmem:[%s2489_s4] ss:$0 sm:$0xff] }
 0x1ed   : > { %v782_v56 = vpack.c.bf16 %v736_v54, %v734_v53  ;;  %v638_v57 = vpop.f32.mrb[60].mxu0 }
 0x1ee   : > { %v639_v58 = vadd.f32 %v638_v57, %v2277_v32  ;;  %v640_v59 = vpop.f32.mrb[61].mxu0 }
 0x1ef   : > { %v641_v60 = vadd.f32 %v640_v59, %v2279_v33  ;;  %v642_v61 = vpop.f32.mrb[62].mxu0  ;;  %1070 = vmatprep.mubr.bf16.mxu1 %v782_v56 }
 0x1f0   : > { %v643_v62 = vadd.f32 %v642_v61, %v2277_v32  ;;  %v644_v63 = vpop.f32.mrb[63].mxu0  ;;  %1071 = vmatmul.mubr.bf16.gmra.mrb[48].mxu1 %v781_v55  ;;  %v737_v2 = vmax.f32 %v639_v58, 0.0 }
 0x1f1   : > { %v645_v1 = vadd.f32 %v644_v63, %v2279_v33  ;;  %v738_v4 = vmax.f32 %v641_v60, 0.0 }
 0x1f2   : > { %v739_v3 = vmax.f32 %v643_v62, 0.0 }
 0x1f3   : > { %v740_v5 = vmax.f32 %v645_v1, 0.0 }
 0x1f4   : > { %v783_v6 = vpack.c.bf16 %v739_v3, %v737_v2 }
 0x1f5   : > { %v784_v7 = vpack.c.bf16 %v740_v5, %v738_v4  ;;  %v648_v8 = vpop.f32.mrb[64].mxu0 }
 0x1f6   : > { %v649_v9 = vadd.f32 %v648_v8, %v2277_v32  ;;  %v650_v10 = vpop.f32.mrb[65].mxu0 }
 0x1f7   : > { %v651_v11 = vadd.f32 %v650_v10, %v2279_v33  ;;  %v652_v12 = vpop.f32.mrb[66].mxu0  ;;  %1078 = vmatprep.mubr.bf16.mxu1 %v784_v7 }
 0x1f8   : > { %v653_v13 = vadd.f32 %v652_v12, %v2277_v32  ;;  %v654_v14 = vpop.f32.mrb[67].mxu0  ;;  %1079 = vmatmul.mubr.bf16.gmra.mrb[52].mxu1 %v783_v6  ;;  %v741_v16 = vmax.f32 %v649_v9, 0.0 }
 0x1f9   : > { %v655_v15 = vadd.f32 %v654_v14, %v2279_v33  ;;  %v742_v18 = vmax.f32 %v651_v11, 0.0 }
 0x1fa   : > { %v743_v17 = vmax.f32 %v653_v13, 0.0 }
 0x1fb   : > { %v744_v19 = vmax.f32 %v655_v15, 0.0 }
 0x1fc   : > { %v785_v20 = vpack.c.bf16 %v743_v17, %v741_v16 }
 0x1fd   : > { %v786_v21 = vpack.c.bf16 %v744_v19, %v742_v18  ;;  %v658_v22 = vpop.f32.mrb[68].mxu0 }
 0x1fe   : > { %v659_v23 = vadd.f32 %v658_v22, %v2277_v32  ;;  %v660_v24 = vpop.f32.mrb[69].mxu0 }
 0x1ff   : > { %v661_v25 = vadd.f32 %v660_v24, %v2279_v33  ;;  %v662_v26 = vpop.f32.mrb[70].mxu0  ;;  %1086 = vmatprep.mubr.bf16.mxu1 %v786_v21 }
 0x200   : > { %v663_v27 = vadd.f32 %v662_v26, %v2277_v32  ;;  %v664_v28 = vpop.f32.mrb[71].mxu0  ;;  %1087 = vmatmul.mubr.bf16.gmra.mrb[56].mxu1 %v785_v20  ;;  %v745_v30 = vmax.f32 %v659_v23, 0.0 }
 0x201   : > { %v665_v29 = vadd.f32 %v664_v28, %v2279_v33  ;;  %v746_v34 = vmax.f32 %v661_v25, 0.0 }
 0x202   : > { %v747_v31 = vmax.f32 %v663_v27, 0.0 }
 0x203   : > { %v748_v35 = vmax.f32 %v665_v29, 0.0 }
 0x204   : > { %v787_v0 = vpack.c.bf16 %v747_v31, %v745_v30 }
 0x205   : > { %v788_v36 = vpack.c.bf16 %v748_v35, %v746_v34  ;;  %v668_v37 = vpop.f32.mrb[72].mxu0 }
 0x206   : > { %v669_v38 = vadd.f32 %v668_v37, %v2277_v32  ;;  %v670_v39 = vpop.f32.mrb[73].mxu0 }
 0x207   : > { %v671_v40 = vadd.f32 %v670_v39, %v2279_v33  ;;  %v672_v41 = vpop.f32.mrb[74].mxu0  ;;  %1094 = vmatprep.mubr.bf16.mxu1 %v788_v36 }
 0x208   : > { %v673_v42 = vadd.f32 %v672_v41, %v2277_v32  ;;  %v674_v43 = vpop.f32.mrb[75].mxu0  ;;  %1095 = vmatmul.mubr.bf16.gmra.mrb[60].mxu1 %v787_v0  ;;  %v749_v45 = vmax.f32 %v669_v38, 0.0 }
 0x209   : > { %v675_v44 = vadd.f32 %v674_v43, %v2279_v33  ;;  %v750_v47 = vmax.f32 %v671_v40, 0.0 }
 0x20a   : > { %v751_v46 = vmax.f32 %v673_v42, 0.0 }
 0x20b   : > { %v752_v48 = vmax.f32 %v675_v44, 0.0 }
 0x20c   : > { %v789_v49 = vpack.c.bf16 %v751_v46, %v749_v45 }
 0x20d   : > { %v790_v50 = vpack.c.bf16 %v752_v48, %v750_v47 }
 0x20f   : > { %1102 = vmatprep.mubr.bf16.mxu1 %v790_v50 }
 0x210   : > { %1103 = vmatmul.mubr.bf16.gmra.mrb[64].mxu1 %v789_v49 }
 0x253   : > { %v960_v52 = vpop.f32.mrb[76].mxu0 }
 0x254   : > { %v962_v32 = vpop.f32.mrb[77].mxu0  ;;  %v961_v54 = vadd.f32 %v2360_v51, %v960_v52 }
 0x255   : > { %v963_v53 = vpop.f32.mrb[78].mxu0 }
 0x256   : > { %v964_v33 = vadd.f32 %v2360_v51, %v963_v53  ;;  %v965_v55 = vpop.f32.mrb[79].mxu0 }
 0x258   : > { %v1547_v56 = vpack.c.bf16 %v964_v33, %v961_v54 }
 0x25a   : > { %1548 = vst [vmem:[%s2365_s8] sm:$0xff] %v1547_v56  }
 0x25b   : > { %v968_v57 = vpop.f32.mrb[80].mxu0 }
 0x25c   : > { %v970_v58 = vpop.f32.mrb[81].mxu0  ;;  %v969_v60 = vadd.f32 %v2360_v51, %v968_v57 }
 0x25d   : > { %v971_v59 = vpop.f32.mrb[82].mxu0 }
 0x25e   : > { %v972_v61 = vadd.f32 %v2360_v51, %v971_v59  ;;  %v973_v62 = vpop.f32.mrb[83].mxu0 }
 0x260   : > { %v1552_v63 = vpack.c.bf16 %v972_v61, %v969_v60 }
 0x262   : > { %1639 = vst [vmem:[%s2365_s8 + $0x8] sm:$0xff] %v1552_v63  }
 0x263   : > { %v976_v1 = vpop.f32.mrb[0].mxu1 }
 0x264   : > { %v978_v2 = vpop.f32.mrb[1].mxu1  ;;  %v977_v4 = vadd.f32 %v2360_v51, %v976_v1 }
 0x265   : > { %v979_v3 = vpop.f32.mrb[2].mxu1 }
 0x266   : > { %v980_v5 = vadd.f32 %v2360_v51, %v979_v3  ;;  %v981_v6 = vpop.f32.mrb[3].mxu1 }
 0x268   : > { %v1557_v7 = vpack.c.bf16 %v980_v5, %v977_v4 }
 0x26a   : > { %1640 = vst [vmem:[%s2365_s8 + $0x10] sm:$0xff] %v1557_v7  }
 0x26b   : > { %v984_v8 = vpop.f32.mrb[4].mxu1 }
 0x26c   : > { %v986_v9 = vpop.f32.mrb[5].mxu1  ;;  %v985_v11 = vadd.f32 %v2360_v51, %v984_v8 }
 0x26d   : > { %v987_v10 = vpop.f32.mrb[6].mxu1 }
 0x26e   : > { %v988_v12 = vadd.f32 %v2360_v51, %v987_v10  ;;  %v989_v13 = vpop.f32.mrb[7].mxu1 }
 0x270   : > { %v1562_v14 = vpack.c.bf16 %v988_v12, %v985_v11 }
 0x272   : > { %1641 = vst [vmem:[%s2365_s8 + $0x18] sm:$0xff] %v1562_v14  }
 0x273   : > { %v992_v15 = vpop.f32.mrb[8].mxu1 }
 0x274   : > { %v994_v16 = vpop.f32.mrb[9].mxu1  ;;  %v993_v18 = vadd.f32 %v2360_v51, %v992_v15 }
 0x275   : > { %v995_v17 = vpop.f32.mrb[10].mxu1 }
 0x276   : > { %v996_v19 = vadd.f32 %v2360_v51, %v995_v17  ;;  %v997_v20 = vpop.f32.mrb[11].mxu1 }
 0x278   : > { %v1567_v21 = vpack.c.bf16 %v996_v19, %v993_v18 }
 0x27a   : > { %1642 = vst [vmem:[%s2365_s8 + $0x20] sm:$0xff] %v1567_v21  }
 0x27b   : > { %v1000_v22 = vpop.f32.mrb[12].mxu1 }
 0x27c   : > { %v1002_v23 = vpop.f32.mrb[13].mxu1  ;;  %v1001_v25 = vadd.f32 %v2360_v51, %v1000_v22 }
 0x27d   : > { %v1003_v24 = vpop.f32.mrb[14].mxu1 }
 0x27e   : > { %v1004_v26 = vadd.f32 %v2360_v51, %v1003_v24  ;;  %v1005_v27 = vpop.f32.mrb[15].mxu1 }
 0x280   : > { %v1572_v28 = vpack.c.bf16 %v1004_v26, %v1001_v25 }
 0x282   : > { %1643 = vst [vmem:[%s2365_s8 + $0x28] sm:$0xff] %v1572_v28  }
 0x283   : > { %v1008_v29 = vpop.f32.mrb[16].mxu1 }
 0x284   : > { %v1010_v30 = vpop.f32.mrb[17].mxu1  ;;  %v1009_v34 = vadd.f32 %v2360_v51, %v1008_v29 }
 0x285   : > { %v1011_v31 = vpop.f32.mrb[18].mxu1 }
 0x286   : > { %v1012_v35 = vadd.f32 %v2360_v51, %v1011_v31  ;;  %v1013_v0 = vpop.f32.mrb[19].mxu1 }
 0x288   : > { %v1577_v36 = vpack.c.bf16 %v1012_v35, %v1009_v34 }
 0x28a   : > { %1644 = vst [vmem:[%s2365_s8 + $0x30] sm:$0xff] %v1577_v36  }
 0x28b   : > { %v1016_v37 = vpop.f32.mrb[20].mxu1 }
 0x28c   : > { %v1018_v38 = vpop.f32.mrb[21].mxu1  ;;  %v1017_v40 = vadd.f32 %v2360_v51, %v1016_v37 }
 0x28d   : > { %v1019_v39 = vpop.f32.mrb[22].mxu1 }
 0x28e   : > { %v1020_v41 = vadd.f32 %v2360_v51, %v1019_v39  ;;  %v1021_v42 = vpop.f32.mrb[23].mxu1 }
 0x290   : > { %v1582_v43 = vpack.c.bf16 %v1020_v41, %v1017_v40 }
 0x292   : > { %1645 = vst [vmem:[%s2365_s8 + $0x38] sm:$0xff] %v1582_v43  }
 0x293   : > { %v1024_v44 = vpop.f32.mrb[24].mxu1 }
 0x294   : > { %v1026_v45 = vpop.f32.mrb[25].mxu1  ;;  %v1025_v47 = vadd.f32 %v2360_v51, %v1024_v44 }
 0x295   : > { %v1027_v46 = vpop.f32.mrb[26].mxu1 }
 0x296   : > { %v1028_v48 = vadd.f32 %v2360_v51, %v1027_v46  ;;  %v1029_v49 = vpop.f32.mrb[27].mxu1 }
 0x298   : > { %v1587_v50 = vpack.c.bf16 %v1028_v48, %v1025_v47 }
 0x29a   : > { %1646 = vst [vmem:[%s2365_s8 + $0x40] sm:$0xff] %v1587_v50  }
 0x29b   : > { %v1032_v52 = vpop.f32.mrb[28].mxu1 }
 0x29c   : > { %v1034_v32 = vpop.f32.mrb[29].mxu1  ;;  %v1033_v54 = vadd.f32 %v2360_v51, %v1032_v52 }
 0x29d   : > { %v1035_v53 = vpop.f32.mrb[30].mxu1 }
 0x29e   : > { %v1036_v33 = vadd.f32 %v2360_v51, %v1035_v53  ;;  %v1037_v55 = vpop.f32.mrb[31].mxu1 }
 0x2a0   : > { %v1592_v56 = vpack.c.bf16 %v1036_v33, %v1033_v54 }
 0x2a2   : > { %1647 = vst [vmem:[%s2365_s8 + $0x48] sm:$0xff] %v1592_v56  }
 0x2a3   : > { %v1040_v57 = vpop.f32.mrb[32].mxu1 }
 0x2a4   : > { %v1042_v58 = vpop.f32.mrb[33].mxu1  ;;  %v1041_v60 = vadd.f32 %v2360_v51, %v1040_v57 }
 0x2a5   : > { %v1043_v59 = vpop.f32.mrb[34].mxu1 }
 0x2a6   : > { %v1044_v61 = vadd.f32 %v2360_v51, %v1043_v59  ;;  %v1045_v62 = vpop.f32.mrb[35].mxu1 }
 0x2a8   : > { %v1597_v63 = vpack.c.bf16 %v1044_v61, %v1041_v60 }
 0x2aa   : > { %1648 = vst [vmem:[%s2365_s8 + $0x50] sm:$0xff] %v1597_v63  }
 0x2ab   : > { %v1048_v1 = vpop.f32.mrb[36].mxu1 }
 0x2ac   : > { %v1050_v2 = vpop.f32.mrb[37].mxu1  ;;  %v1049_v4 = vadd.f32 %v2360_v51, %v1048_v1 }
 0x2ad   : > { %v1051_v3 = vpop.f32.mrb[38].mxu1 }
 0x2ae   : > { %v1052_v5 = vadd.f32 %v2360_v51, %v1051_v3  ;;  %v1053_v6 = vpop.f32.mrb[39].mxu1 }
 0x2b0   : > { %v1602_v7 = vpack.c.bf16 %v1052_v5, %v1049_v4 }
 0x2b2   : > { %1649 = vst [vmem:[%s2365_s8 + $0x58] sm:$0xff] %v1602_v7  }
 0x2b3   : > { %v1056_v8 = vpop.f32.mrb[40].mxu1 }
 0x2b4   : > { %v1058_v9 = vpop.f32.mrb[41].mxu1  ;;  %v1057_v11 = vadd.f32 %v2360_v51, %v1056_v8 }
 0x2b5   : > { %v1059_v10 = vpop.f32.mrb[42].mxu1 }
 0x2b6   : > { %v1060_v12 = vadd.f32 %v2360_v51, %v1059_v10  ;;  %v1061_v13 = vpop.f32.mrb[43].mxu1 }
 0x2b8   : > { %v1607_v14 = vpack.c.bf16 %v1060_v12, %v1057_v11 }
 0x2ba   : > { %1650 = vst [vmem:[%s2365_s8 + $0x60] sm:$0xff] %v1607_v14  }
 0x2bb   : > { %v1064_v15 = vpop.f32.mrb[44].mxu1 }
 0x2bc   : > { %v1066_v16 = vpop.f32.mrb[45].mxu1  ;;  %v1065_v18 = vadd.f32 %v2360_v51, %v1064_v15 }
 0x2bd   : > { %v1067_v17 = vpop.f32.mrb[46].mxu1 }
 0x2be   : > { %v1068_v19 = vadd.f32 %v2360_v51, %v1067_v17  ;;  %v1069_v20 = vpop.f32.mrb[47].mxu1 }
 0x2c0   : > { %v1612_v21 = vpack.c.bf16 %v1068_v19, %v1065_v18 }
 0x2c2   : > { %1651 = vst [vmem:[%s2365_s8 + $0x68] sm:$0xff] %v1612_v21  }
 0x2c3   : > { %v1072_v22 = vpop.f32.mrb[48].mxu1 }
 0x2c4   : > { %v1074_v23 = vpop.f32.mrb[49].mxu1  ;;  %v1073_v25 = vadd.f32 %v2360_v51, %v1072_v22 }
 0x2c5   : > { %v1075_v24 = vpop.f32.mrb[50].mxu1 }
 0x2c6   : > { %v1076_v26 = vadd.f32 %v2360_v51, %v1075_v24  ;;  %v1077_v27 = vpop.f32.mrb[51].mxu1 }
 0x2c8   : > { %v1617_v28 = vpack.c.bf16 %v1076_v26, %v1073_v25 }
 0x2ca   : > { %1652 = vst [vmem:[%s2365_s8 + $0x70] sm:$0xff] %v1617_v28  }
 0x2cb   : > { %v1080_v29 = vpop.f32.mrb[52].mxu1 }
 0x2cc   : > { %v1082_v30 = vpop.f32.mrb[53].mxu1  ;;  %v1081_v34 = vadd.f32 %v2360_v51, %v1080_v29 }
 0x2cd   : > { %v1083_v31 = vpop.f32.mrb[54].mxu1 }
 0x2ce   : > { %v1084_v35 = vadd.f32 %v2360_v51, %v1083_v31  ;;  %v1085_v0 = vpop.f32.mrb[55].mxu1 }
 0x2d0   : > { %v1622_v36 = vpack.c.bf16 %v1084_v35, %v1081_v34 }
 0x2d2   : > { %1653 = vst [vmem:[%s2365_s8 + $0x78] sm:$0xff] %v1622_v36  }
 0x2d3   : > { %v1088_v37 = vpop.f32.mrb[56].mxu1 }
 0x2d4   : > { %v1090_v38 = vpop.f32.mrb[57].mxu1  ;;  %v1089_v40 = vadd.f32 %v2360_v51, %v1088_v37 }
 0x2d5   : > { %v1091_v39 = vpop.f32.mrb[58].mxu1 }
 0x2d6   : > { %v1092_v41 = vadd.f32 %v2360_v51, %v1091_v39  ;;  %v1093_v42 = vpop.f32.mrb[59].mxu1 }
 0x2d8   : > { %v1627_v43 = vpack.c.bf16 %v1092_v41, %v1089_v40 }
 0x2da   : > { %1654 = vst [vmem:[%s2365_s8 + $0x80] sm:$0xff] %v1627_v43  }
 0x2db   : > { %v1096_v44 = vpop.f32.mrb[60].mxu1 }
 0x2dc   : > { %v1098_v45 = vpop.f32.mrb[61].mxu1  ;;  %v1097_v47 = vadd.f32 %v2360_v51, %v1096_v44 }
 0x2dd   : > { %v1099_v46 = vpop.f32.mrb[62].mxu1 }
 0x2de   : > { %v1100_v48 = vadd.f32 %v2360_v51, %v1099_v46  ;;  %v1101_v49 = vpop.f32.mrb[63].mxu1 }
 0x2e0   : > { %v1632_v50 = vpack.c.bf16 %v1100_v48, %v1097_v47 }
 0x2e2   : > { %1655 = vst [vmem:[%s2365_s8 + $0x88] sm:$0xff] %v1632_v50  }
 0x2e3   : > { %v1104_v52 = vpop.f32.mrb[64].mxu1 }
 0x2e4   : > { %v1106_v32 = vpop.f32.mrb[65].mxu1  ;;  %v1105_v54 = vadd.f32 %v2360_v51, %v1104_v52  ;;  %1308 = sbr.rel (!%p2506_p9) target bundleno = 775 (0x307), region = 56 }
 0x2e5   : > { %v1107_v53 = vpop.f32.mrb[66].mxu1 }
 0x2e6   : > { %v1108_v33 = vadd.f32 %v2360_v51, %v1107_v53  ;;  %v1109_v55 = vpop.f32.mrb[67].mxu1 }
 0x2e8   : > { %v1637_v56 = vpack.c.bf16 %v1108_v33, %v1105_v54 }
 0x2ea   : > { %1656 = vst [vmem:[%s2365_s8 + $0x90] sm:$0xff] %v1637_v56  }
 0x2eb   : > { %s2516_s25 = smov (!%p1311_p10, %s1310_s25), 38 }
 0x2ec   : > { %s2426_s28 = sshll.u32 %s2516_s25, 6 }
 0x2ed   : > { %s1315_s9 = ssub.s32 2432, %s2426_s28 }
 0x2ee   : > { %1316 = vsyncadd %s1302_s17, %s1315_s9  ;;  %p1498_p1 = scmp.ne.s32.totalorder %s2426_s28, 0  ;;  %s1543_s30 = smul.u32 2432, %s2021_s22 }
 0x2ef   : > { %s1321_s27 = sshll.u32 %s2365_s8, 4  ;;  %s1967_s29 = smov [#allocation8]   ;;  %s2439_s27 = int_to_ptr.vmem [resolvable:$true] %s1321_s27 }
 0x2f0   : > { %s2437_s15 = scalar_lea.hbm %s2490_s5, %s1543_s30  ;;  %s1885_s16 = scalar_lea.vmem %s2439_s27, %s2426_s28 }
 0x2f1   : > { %p1886_p3 = scmp.ne.s32.totalorder %s2439_s27, %s1885_s16  ;;  %s1889_s7 = sshll.u32 %s1967_s29, 4  ;;  %s1890_s7 = int_to_ptr.vmem [resolvable:$false] %s1889_s7 }
 0x2f2   : > { %s1891_s22 = scalar_lea.vmem %s1890_s7, 4864  ;;  %p1892_p11 = scmp.lt.s32.totalorder %s2439_s27, %s1890_s7 }
 0x2f3   : > { %p1887_p5 = pnand %p1886_p3, %p1498_p1  ;;  %p1893_p13 = scmp.lt.s32.totalorder %s1891_s22, %s1885_s16 }
 0x2f5   : > { %p1888_p6 = pneg %p1887_p5  ;;  %p1894_p0 = por %p1893_p13, %p1892_p11 }
 0x2f7   : > { %p1895_p12 = pnand %p1894_p0, %p1888_p6 }
 0x2f9   : > { %1898 = shalt.err (!%p1895_p12)
}
 0x2fa   : > { %s1899_s10 = scalar_lea.hbm %s2437_s15, %s2426_s28  ;;  %s1903_s8 = scalar_lea.hbm %s2490_s5, 4800 }
 0x2fb   : > { %p1900_p7 = scmp.ne.s32.totalorder %s2437_s15, %s1899_s10  ;;  %p1904_p9 = scmp.lt.u32.totalorder %s2437_s15, %s2490_s5 }
 0x2fc   : > { %p1905_p10 = scmp.lt.u32.totalorder %s1903_s8, %s1899_s10  ;;  %p1907_p5 = scmp.lt.u32.totalorder %s1899_s10, %s2437_s15 }
 0x2fd   : > { %p1901_p2 = pnand %p1900_p7, %p1498_p1 }
 0x2fe   : > { %p1906_p3 = por %p1905_p10, %p1904_p9 }
 0x2ff   : > { %p1902_p8 = pneg %p1901_p2 }
 0x300   : > { %p1908_p6 = por %p1907_p5, %p1906_p3 }
 0x302   : > { %p1909_p11 = pnand %p1908_p6, %p1902_p8 }
 0x304   : > { %1912 = shalt.err (!%p1909_p11)
}
 0x305   : > { %s1968_s9 = smov 64   ;;  %s1969_s30 = smov 4  }
 0x306   : > { %1327 = dma.vmem_to_hbm [thread:$0]  (%p1498_p1), %s2439_s27, %s2426_s28, %s2437_s15, %s1302_s17, %s1968_s9, %s1968_s9, %s1969_s30  }
 0x307 PF: > { %s1336_s11 = sand.u32 1, %s1943_s18   ;;  %p2507_p13 = scmp.ne.s32.totalorder %s2498_s6, 0 }
 0x308   : > { %s1337_s14 = scalar_lea.sflag [#allocation4], %s1336_s11 }
 0x309   : > { %p1710_p0 = pnand %p1417_p4, %p2507_p13 }
 0x30b   : > { %1938 = dma.done.wait (!%p1710_p0), %s1337_s14, 2432  }
 0x30c   : > { %1940 = vsyncadd (!%p1710_p0), %s1337_s14, 4294964864  ;;  %s2508_s16 = sld [smem:[#allocation12_spill]]  ;;  %p19_p12 = scmp.ge.s32.totalorder %s2025_s24, 4  }
 0x30d   : > { %s2509_s18 = smov %s1947_s19  ;;  %s2510_s19 = smov %s1951_s20 }
 0x30e   : > { %s2512_s21 = smov %s2025_s24  ;;  %21 = sbr.rel (!%p19_p12) target bundleno = 6 (0x6), region = 93 }
 0x312   : > { %s2511_s20 = smov %s2508_s16 }
 0x315   :  { %1342 = vsyncpa [#allocation3], 1 }
 0x316   :  { %1344 = vsyncpa [#allocation3 + $0x1], 1 }
 0x317   :  { %1345 = vsyncpa [#allocation6], 1 }
 0x318   :  { %1346 = vsyncpa [#allocation4], 1 }
 0x319   :  { %1348 = vsyncpa [#allocation4 + $0x1], 1 }

</bundles_post_ra>
